<compile_context>
chip_gen: v5e
topology: v5e:2x2
jax: 0.10.0
libtpu: 0.0.40
codegen_flags: <defaults>
</compile_context>

<pallas_src>
import functools

import numpy as np
import jax
import jax.numpy as jnp
from jax.experimental import pallas as pl
from jax.experimental.pallas import tpu as pltpu

TIMESTEPS = 1000
LANE = 128


# ----------------------------- schedule (glue) ------------------------------
def cosine_beta_schedule(timesteps, s=0.008):
    steps = timesteps + 1
    x = np.linspace(0, timesteps, steps, dtype=np.float64)
    ac = np.cos((x / timesteps + s) / (1 + s) * np.pi * 0.5) ** 2
    ac = ac / ac[0]
    betas = 1 - ac[1:] / ac[:-1]
    return np.clip(betas, 0, 0.9999)


def make_schedule(timesteps=TIMESTEPS):
    betas = cosine_beta_schedule(timesteps)
    alphas = 1.0 - betas
    alphas_cumprod = np.cumprod(alphas, axis=0)
    sqrt_ac = np.sqrt(alphas_cumprod).astype(np.float32)
    sqrt_omac = np.sqrt(1.0 - alphas_cumprod).astype(np.float32)
    return jnp.asarray(sqrt_ac), jnp.asarray(sqrt_omac)


# -------------------------------- kernel ------------------------------------
def _p_losses_kernel(params_ref, x_ref, noise_ref, out_ref, *, C, R, tile_n):
    # params columns: 0: sqrt(ac[t]), 1: sqrt(1-ac[t]), 2: temb bias,
    #                 3..3+C-1: coefA_j, 3+C..3+2C-1: coefB_j (masked weights)
    p = params_ref[...]                      # (R, 3 + 2C), one vreg
    c1 = p[:, 0:1]
    c2 = p[:, 1:2]
    temb = p[:, 2:3]

    x = x_ref[...]                           # (R, tile_n) raw (unnormalized)
    noise = noise_ref[...]                   # (R, tile_n)

    # normalize_img + q_sample fused (pure VPU):
    x_noisy = c1 * (x * 2.0 - 1.0) + c2 * noise

    # synthetic denoise_fn: per-batch CxC channel mix as sublane rolls (XLU)
    # + per-row broadcast FMAs (VPU).  For row r = b*C + c:
    #   h[r] = sum_j W[c,(c+j)%C] * x_noisy[b*C + (c+j)%C]
    # rows with c+j <  C read roll(x_noisy, R-j)[r] == x_noisy[r + j]
    # rows with c+j >= C read roll(x_noisy, C-j)[r] == x_noisy[r + j - C]
    # (the other case's coefficient is zero, folded into coefA/coefB).
    h = p[:, 3:4] * x_noisy                  # j = 0 term, no roll needed
    for j in range(1, C):
        rolled_a = pltpu.roll(x_noisy, R - j, 0)
        h = h + p[:, 3 + j:4 + j] * rolled_a
        rolled_b = pltpu.roll(x_noisy, C - j, 0)
        h = h + p[:, 3 + C + j:4 + C + j] * rolled_b
    x_recon = jnp.tanh(h + temb)

    # L1 partial, reduced only across 128-lane chunks -> lane-dense (R, 128)
    err = jnp.abs(noise - x_recon)
    acc = err[:, 0:LANE]
    for i in range(1, tile_n // LANE):
        acc = acc + err[:, i * LANE:(i + 1) * LANE]
    out_ref[...] = acc


# ------------------------------- wrapper -------------------------------------
def gaussian_diffusion_forward(x, w, key, sqrt_ac, sqrt_omac, *, max_tile_n=8192):
    """Returns (l1_loss, (t, noise_rows)) — aux returned for the reference check."""
    B, C, F, H, W = x.shape
    N = F * H * W
    R = B * C
    assert R % 8 == 0, "row packing wants B*C to be a multiple of 8 sublanes"
    assert N % LANE == 0

    # biggest 128-multiple tile that divides N (single grid step at small sizes)
    tile_n = LANE
    for cand in range(min(N, max_tile_n), LANE - 1, -LANE):
        if N % cand == 0:
            tile_n = cand
            break
    n_tiles = N // tile_n

    k_t, k_noise = jax.random.split(key)
    # t = randint(0, num_timesteps, (B,))
    t = jax.random.randint(k_t, (B,), 0, sqrt_ac.shape[0], dtype=jnp.int32)

    # free reshape to row layout r = b*C + c; NO pre-normalization pass
    x_rows = x.reshape(R, N).astype(jnp.float32)
    # noise drawn directly in row layout (i.i.d., layout-irrelevant)
    noise_rows = jax.random.normal(k_noise, (R, N), dtype=jnp.float32)

    # ---- tiny per-row parameter table (R, 3 + 2C), one constant block -------
    rows_c = np.arange(R) % C
    c1_row = jnp.repeat(sqrt_ac[t], C)                   # (R,)
    c2_row = jnp.repeat(sqrt_omac[t], C)                 # (R,)
    freqs = (jnp.arange(C, dtype=jnp.float32) + 1.0) * 0.01
    temb_row = jnp.sin(t.astype(jnp.float32)[:, None] * freqs[None, :]).reshape(R)

    coef_a, coef_b = [], []
    for j in range(C):
        kk = (rows_c + j) % C
        vals = w[rows_c, kk]                             # (R,) W[c, (c+j)%C]
        in_block = jnp.asarray((rows_c + j) < C, jnp.float32)
        coef_a.append(vals * in_block)
        coef_b.append(vals * (1.0 - in_block))
    params = jnp.stack([c1_row, c2_row, temb_row] + coef_a + coef_b,
                       axis=1).astype(jnp.float32)       # (R, 3 + 2C)

    kernel = functools.partial(_p_losses_kernel, C=C, R=R, tile_n=tile_n)
    partial_l1 = pl.pallas_call(
        kernel,
        out_shape=jax.ShapeDtypeStruct((n_tiles * R, LANE), jnp.float32),
        grid=(n_tiles,),
        in_specs=[
            pl.BlockSpec((R, 3 + 2 * C), lambda j: (0, 0)),   # params (constant)
            pl.BlockSpec((R, tile_n), lambda j: (0, j)),      # raw x rows
            pl.BlockSpec((R, tile_n), lambda j: (0, j)),      # noise rows
        ],
        out_specs=pl.BlockSpec((R, LANE), lambda j: (j, 0)),  # lane-dense partials
        compiler_params=pltpu.CompilerParams(
            dimension_semantics=("parallel",),
            vmem_limit_bytes=32 * 1024 * 1024),
    )(params, x_rows, noise_rows)

    loss = jnp.sum(partial_l1) / (R * N)    # F.l1_loss reduction='mean'
    return loss, (t, noise_rows)


# ------------------------------ reference ------------------------------------
def reference_loss(x, noise_rows, t, w, sqrt_ac, sqrt_omac):
    B, C, F, H, W = x.shape
    N = F * H * W
    x_norm = x.reshape(B, C, N).astype(jnp.float32) * 2.0 - 1.0
    noise = noise_rows.reshape(B, C, N)
    c1 = sqrt_ac[t][:, None, None]
    c2 = sqrt_omac[t][:, None, None]
    x_noisy = c1 * x_norm + c2 * noise
    freqs = (jnp.arange(C, dtype=jnp.float32) + 1.0) * 0.01
    temb = jnp.sin(t.astype(jnp.float32)[:, None] * freqs[None, :])[:, :, None]
    x_recon = jnp.tanh(jnp.einsum('ck,bkn->bcn', w, x_noisy) + temb)
    return jnp.mean(jnp.abs(noise - x_recon))


if __name__ == "__main__":
    key = jax.random.PRNGKey(0)
    B, C, F, H, W = 2, 4, 8, 16, 16        # batch, channels, num_frames, image_size
    kx, kfwd = jax.random.split(key)

    # image in [0, 1] like unnormalized video frames
    x = jax.random.uniform(kx, (B, C, F, H, W), dtype=jnp.float32)

    sqrt_ac, sqrt_omac = make_schedule(TIMESTEPS)

    # deterministic 1x1x1 conv weight for the synthetic denoise_fn
    w = (0.5 * jnp.eye(C, dtype=jnp.float32)
         + 0.05 * jnp.sin(jnp.arange(C * C, dtype=jnp.float32)).reshape(C, C))

    loss, (t, noise_rows) = gaussian_diffusion_forward(x, w, kfwd, sqrt_ac, sqrt_omac)
    loss = jax.block_until_ready(loss)

    ref = jax.block_until_ready(reference_loss(x, noise_rows, t, w, sqrt_ac, sqrt_omac))
    assert np.allclose(np.asarray(loss), np.asarray(ref), rtol=1e-4, atol=1e-5), \
        (float(loss), float(ref))

    print("KERNEL_OK")
</pallas_src>

<mosaic_0001>
module attributes {stable_mosaic.version = 11 : i64} {
  func.func @_p_losses_kernel(%arg0: i32, %arg1: memref<8x11xf32, #tpu.memory_space<vmem>>, %arg2: memref<8x2048xf32, #tpu.memory_space<vmem>>, %arg3: memref<8x2048xf32, #tpu.memory_space<vmem>>, %arg4: memref<8x128xf32, #tpu.memory_space<vmem>>) attributes {dimension_semantics = [#tpu.dimension_semantics<parallel>], iteration_bounds = array<i64: 1>, scalar_prefetch = 0 : i64, scratch_operands = 0 : i64, tpu.core_type = #tpu.core_type<tc>, window_params = [{pipeline_mode = #tpu.pipeline_mode<synchronous>, transform_indices = @transform_0, window_bounds = array<i64: 8, 11>}, {transform_indices = @transform_1, window_bounds = array<i64: 8, 2048>}, {transform_indices = @transform_2, window_bounds = array<i64: 8, 2048>}, {transform_indices = @transform_3, window_bounds = array<i64: 8, 128>}]} {
    %c0 = arith.constant 0 : index
    %c0_0 = arith.constant 0 : index
    %0 = vector.load %arg1[%c0, %c0_0] : memref<8x11xf32, #tpu.memory_space<vmem>>, vector<8x11xf32>
    %1 = vector.extract_strided_slice %0 {offsets = [0, 0], sizes = [8, 1], strides = [1, 1]} : vector<8x11xf32> to vector<8x1xf32>
    %2 = vector.extract_strided_slice %0 {offsets = [0, 1], sizes = [8, 1], strides = [1, 1]} : vector<8x11xf32> to vector<8x1xf32>
    %3 = vector.extract_strided_slice %0 {offsets = [0, 2], sizes = [8, 1], strides = [1, 1]} : vector<8x11xf32> to vector<8x1xf32>
    %c0_1 = arith.constant 0 : index
    %c0_2 = arith.constant 0 : index
    %4 = vector.load %arg2[%c0_1, %c0_2] : memref<8x2048xf32, #tpu.memory_space<vmem>>, vector<8x2048xf32>
    %c0_3 = arith.constant 0 : index
    %c0_4 = arith.constant 0 : index
    %5 = vector.load %arg3[%c0_3, %c0_4] : memref<8x2048xf32, #tpu.memory_space<vmem>>, vector<8x2048xf32>
    %cst = arith.constant 2.000000e+00 : f32
    %6 = vector.broadcast %cst : f32 to vector<8x2048xf32>
    %7 = arith.mulf %4, %6 : vector<8x2048xf32>
    %cst_5 = arith.constant 1.000000e+00 : f32
    %8 = vector.broadcast %cst_5 : f32 to vector<8x2048xf32>
    %9 = arith.subf %7, %8 : vector<8x2048xf32>
    %10 = vector.broadcast %1 : vector<8x1xf32> to vector<8x2048xf32>
    %11 = arith.mulf %10, %9 : vector<8x2048xf32>
    %12 = vector.broadcast %2 : vector<8x1xf32> to vector<8x2048xf32>
    %13 = arith.mulf %12, %5 : vector<8x2048xf32>
    %14 = arith.addf %11, %13 : vector<8x2048xf32>
    %15 = vector.extract_strided_slice %0 {offsets = [0, 3], sizes = [8, 1], strides = [1, 1]} : vector<8x11xf32> to vector<8x1xf32>
    %16 = vector.broadcast %15 : vector<8x1xf32> to vector<8x2048xf32>
    %17 = arith.mulf %16, %14 : vector<8x2048xf32>
    %c7_i32 = arith.constant 7 : i32
    %18 = tpu.dynamic_rotate %14 by %c7_i32 dim 0 : vector<8x2048xf32>, i32 -> vector<8x2048xf32>
    %19 = vector.extract_strided_slice %0 {offsets = [0, 4], sizes = [8, 1], strides = [1, 1]} : vector<8x11xf32> to vector<8x1xf32>
    %20 = vector.broadcast %19 : vector<8x1xf32> to vector<8x2048xf32>
    %21 = arith.mulf %20, %18 : vector<8x2048xf32>
    %22 = arith.addf %17, %21 : vector<8x2048xf32>
    %c3_i32 = arith.constant 3 : i32
    %23 = tpu.dynamic_rotate %14 by %c3_i32 dim 0 : vector<8x2048xf32>, i32 -> vector<8x2048xf32>
    %24 = vector.extract_strided_slice %0 {offsets = [0, 8], sizes = [8, 1], strides = [1, 1]} : vector<8x11xf32> to vector<8x1xf32>
    %25 = vector.broadcast %24 : vector<8x1xf32> to vector<8x2048xf32>
    %26 = arith.mulf %25, %23 : vector<8x2048xf32>
    %27 = arith.addf %22, %26 : vector<8x2048xf32>
    %c6_i32 = arith.constant 6 : i32
    %28 = tpu.dynamic_rotate %14 by %c6_i32 dim 0 : vector<8x2048xf32>, i32 -> vector<8x2048xf32>
    %29 = vector.extract_strided_slice %0 {offsets = [0, 5], sizes = [8, 1], strides = [1, 1]} : vector<8x11xf32> to vector<8x1xf32>
    %30 = vector.broadcast %29 : vector<8x1xf32> to vector<8x2048xf32>
    %31 = arith.mulf %30, %28 : vector<8x2048xf32>
    %32 = arith.addf %27, %31 : vector<8x2048xf32>
    %c2_i32 = arith.constant 2 : i32
    %33 = tpu.dynamic_rotate %14 by %c2_i32 dim 0 : vector<8x2048xf32>, i32 -> vector<8x2048xf32>
    %34 = vector.extract_strided_slice %0 {offsets = [0, 9], sizes = [8, 1], strides = [1, 1]} : vector<8x11xf32> to vector<8x1xf32>
    %35 = vector.broadcast %34 : vector<8x1xf32> to vector<8x2048xf32>
    %36 = arith.mulf %35, %33 : vector<8x2048xf32>
    %37 = arith.addf %32, %36 : vector<8x2048xf32>
    %c5_i32 = arith.constant 5 : i32
    %38 = tpu.dynamic_rotate %14 by %c5_i32 dim 0 : vector<8x2048xf32>, i32 -> vector<8x2048xf32>
    %39 = vector.extract_strided_slice %0 {offsets = [0, 6], sizes = [8, 1], strides = [1, 1]} : vector<8x11xf32> to vector<8x1xf32>
    %40 = vector.broadcast %39 : vector<8x1xf32> to vector<8x2048xf32>
    %41 = arith.mulf %40, %38 : vector<8x2048xf32>
    %42 = arith.addf %37, %41 : vector<8x2048xf32>
    %c1_i32 = arith.constant 1 : i32
    %43 = tpu.dynamic_rotate %14 by %c1_i32 dim 0 : vector<8x2048xf32>, i32 -> vector<8x2048xf32>
    %44 = vector.extract_strided_slice %0 {offsets = [0, 10], sizes = [8, 1], strides = [1, 1]} : vector<8x11xf32> to vector<8x1xf32>
    %45 = vector.broadcast %44 : vector<8x1xf32> to vector<8x2048xf32>
    %46 = arith.mulf %45, %43 : vector<8x2048xf32>
    %47 = arith.addf %42, %46 : vector<8x2048xf32>
    %48 = vector.broadcast %3 : vector<8x1xf32> to vector<8x2048xf32>
    %49 = arith.addf %47, %48 : vector<8x2048xf32>
    %50 = math.tanh %49 : vector<8x2048xf32>
    %51 = arith.subf %5, %50 : vector<8x2048xf32>
    %52 = math.absf %51 : vector<8x2048xf32>
    %53 = vector.extract_strided_slice %52 {offsets = [0, 0], sizes = [8, 128], strides = [1, 1]} : vector<8x2048xf32> to vector<8x128xf32>
    %54 = vector.extract_strided_slice %52 {offsets = [0, 128], sizes = [8, 128], strides = [1, 1]} : vector<8x2048xf32> to vector<8x128xf32>
    %55 = arith.addf %53, %54 : vector<8x128xf32>
    %56 = vector.extract_strided_slice %52 {offsets = [0, 256], sizes = [8, 128], strides = [1, 1]} : vector<8x2048xf32> to vector<8x128xf32>
    %57 = arith.addf %55, %56 : vector<8x128xf32>
    %58 = vector.extract_strided_slice %52 {offsets = [0, 384], sizes = [8, 128], strides = [1, 1]} : vector<8x2048xf32> to vector<8x128xf32>
    %59 = arith.addf %57, %58 : vector<8x128xf32>
    %60 = vector.extract_strided_slice %52 {offsets = [0, 512], sizes = [8, 128], strides = [1, 1]} : vector<8x2048xf32> to vector<8x128xf32>
    %61 = arith.addf %59, %60 : vector<8x128xf32>
    %62 = vector.extract_strided_slice %52 {offsets = [0, 640], sizes = [8, 128], strides = [1, 1]} : vector<8x2048xf32> to vector<8x128xf32>
    %63 = arith.addf %61, %62 : vector<8x128xf32>
    %64 = vector.extract_strided_slice %52 {offsets = [0, 768], sizes = [8, 128], strides = [1, 1]} : vector<8x2048xf32> to vector<8x128xf32>
    %65 = arith.addf %63, %64 : vector<8x128xf32>
    %66 = vector.extract_strided_slice %52 {offsets = [0, 896], sizes = [8, 128], strides = [1, 1]} : vector<8x2048xf32> to vector<8x128xf32>
    %67 = arith.addf %65, %66 : vector<8x128xf32>
    %68 = vector.extract_strided_slice %52 {offsets = [0, 1024], sizes = [8, 128], strides = [1, 1]} : vector<8x2048xf32> to vector<8x128xf32>
    %69 = arith.addf %67, %68 : vector<8x128xf32>
    %70 = vector.extract_strided_slice %52 {offsets = [0, 1152], sizes = [8, 128], strides = [1, 1]} : vector<8x2048xf32> to vector<8x128xf32>
    %71 = arith.addf %69, %70 : vector<8x128xf32>
    %72 = vector.extract_strided_slice %52 {offsets = [0, 1280], sizes = [8, 128], strides = [1, 1]} : vector<8x2048xf32> to vector<8x128xf32>
    %73 = arith.addf %71, %72 : vector<8x128xf32>
    %74 = vector.extract_strided_slice %52 {offsets = [0, 1408], sizes = [8, 128], strides = [1, 1]} : vector<8x2048xf32> to vector<8x128xf32>
    %75 = arith.addf %73, %74 : vector<8x128xf32>
    %76 = vector.extract_strided_slice %52 {offsets = [0, 1536], sizes = [8, 128], strides = [1, 1]} : vector<8x2048xf32> to vector<8x128xf32>
    %77 = arith.addf %75, %76 : vector<8x128xf32>
    %78 = vector.extract_strided_slice %52 {offsets = [0, 1664], sizes = [8, 128], strides = [1, 1]} : vector<8x2048xf32> to vector<8x128xf32>
    %79 = arith.addf %77, %78 : vector<8x128xf32>
    %80 = vector.extract_strided_slice %52 {offsets = [0, 1792], sizes = [8, 128], strides = [1, 1]} : vector<8x2048xf32> to vector<8x128xf32>
    %81 = arith.addf %79, %80 : vector<8x128xf32>
    %82 = vector.extract_strided_slice %52 {offsets = [0, 1920], sizes = [8, 128], strides = [1, 1]} : vector<8x2048xf32> to vector<8x128xf32>
    %83 = arith.addf %81, %82 : vector<8x128xf32>
    %c0_6 = arith.constant 0 : index
    %c0_7 = arith.constant 0 : index
    %84 = vector.load %arg4[%c0_6, %c0_7] : memref<8x128xf32, #tpu.memory_space<vmem>>, vector<8x128xf32>
    tpu.vector_store %arg4[%c0_6, %c0_7], %83 {strides = array<i32>} : memref<8x128xf32, #tpu.memory_space<vmem>>, vector<8x128xf32>,
    return
  }
  func.func @transform_0(%arg0: i32) -> (i32, i32) {
    %c0_i32 = arith.constant 0 : i32
    %c0_i32_0 = arith.constant 0 : i32
    %c0_i32_1 = arith.constant 0 : i32
    return %c0_i32, %c0_i32_0 : i32, i32
  }
  func.func @transform_1(%arg0: i32) -> (i32, i32) {
    %c0_i32 = arith.constant 0 : i32
    %c0_i32_0 = arith.constant 0 : i32
    return %c0_i32, %arg0 : i32, i32
  }
  func.func @transform_2(%arg0: i32) -> (i32, i32) {
    %c0_i32 = arith.constant 0 : i32
    %c0_i32_0 = arith.constant 0 : i32
    return %c0_i32, %arg0 : i32, i32
  }
  func.func @transform_3(%arg0: i32) -> (i32, i32) {
    %c0_i32 = arith.constant 0 : i32
    %c0_i32_0 = arith.constant 0 : i32
    return %arg0, %c0_i32 : i32, i32
  }
}

</mosaic_0001>

<bundles_post_ra>
// kernel: tpu_custom_call.1
= control target key start
LH: loop header
LB: loop body
LE: loop exit
PB: predicated region body
PF: predicated region fallthrough
CT: control target
= control target key end

     0   :  { %8 = vsyncpa [#allocation3], 0  ;;  %s1140_s0 = inlined_call_operand.hbm [shape: f32[8,11], index: 0, kind: input, shape index: {}]   ;;  %s1141_s1 = inlined_call_operand.hbm [shape: f32[8,2048], index: 1, kind: input, shape index: {}]   ;;  %s1142_s2 = inlined_call_operand.hbm [shape: f32[8,2048], index: 2, kind: input, shape index: {}]   ;;  %s1143_s3 = inlined_call_operand.hbm [shape: f32[8,128], index: 3, kind: output, shape index: {}]  }
   0x1   :  { %9 = vsyncpa [#allocation6], 0  ;;  %s27_s14 = sshll.u32 %s1141_s1, 4  ;;  %s28_s14 = int_to_ptr.hbm [resolvable:$true] %s27_s14 }
   0x2   :  { %10 = vsyncpa [#allocation4], 0  ;;  %s787_s15 = smov [#allocation5]   ;;  %s16_s19 = sshll.u32 %s1140_s0, 4  ;;  %s17_s19 = int_to_ptr.hbm [resolvable:$true] %s16_s19 }
   0x3   :  { %s29_s16 = sshll.u32 %s787_s15, 4  ;;  %s788_s20 = smov [#allocation2]   ;;  %s30_s16 = int_to_ptr.vmem [resolvable:$true] %s29_s16 }
   0x4   :  { %32 = dma.hbm_to_vmem [thread:$0]  %s28_s14, 2048, %s30_s16, [#allocation6]  }
   0x5   :  { %s18_s21 = sshll.u32 %s788_s20, 4  ;;  %s38_s24 = sshll.u32 %s1142_s2, 4  ;;  %s19_s21 = int_to_ptr.vmem [resolvable:$true] %s18_s21  ;;  %s39_s24 = int_to_ptr.hbm [resolvable:$true] %s38_s24 }
   0x6   :  { %21 = dma.hbm_to_vmem [thread:$0]  %s17_s19, 128, %s19_s21, [#allocation3]  }
   0x7   :  { %s789_s1 = smov [#allocation7]  }
   0x8   :  { %s40_s25 = sshll.u32 %s789_s1, 4  ;;  %s41_s25 = int_to_ptr.vmem [resolvable:$true] %s40_s25 }
   0x9   :  { %43 = dma.hbm_to_vmem [thread:$0]  %s39_s24, 2048, %s41_s25, [#allocation6]  }
   0xa   :  { %781 = dma.done.wait [#allocation3], 128  }
   0xb   :  { %782 = vsyncadd [#allocation3], 4294967168 }
   0xc   :  { %783 = dma.done.wait [#allocation6], 4096  }
   0xd   :  { %784 = vsyncadd [#allocation6], 4294963200  ;;  %v790_v0 = vmov 3   ;;  %v791_v1 = vmov 0   ;;  %v792_v2 = vmov 8   ;;  %v56_v3 = vld [vmem:[#allocation2] sm:$0xff] }
   0xe   :  { %644 = vset.pattern.permute.xlu1 %v790_v0  ;;  %642 = vset.pattern.permute.xlu0 %v791_v1  ;;  %v793_v4 = vmov 4   ;;  %v794_v5 = vmov 1   ;;  %v795_v6 = vmov 5   ;;  %v796_v7 = vmov 9   ;;  %v57_v11 = vld [vmem:[#allocation5] sm:$0xff]  ;;  %v58_v12 = vld [vmem:[#allocation5 + $0x8] sm:$0xff] }
   0xf   :  { %646 = vset.pattern.permute.xlu2 %v792_v2  ;;  %179 = vperm.xlu1 %644, %v56_v3   ;;  %v797_v8 = vmov 10   ;;  %v798_v9 = vmov 6   ;;  %v799_v10 = vmov 2   ;;  %v59_v13 = vld [vmem:[#allocation5 + $0x10] sm:$0xff]  ;;  %v60_v14 = vld [vmem:[#allocation5 + $0x18] sm:$0xff]  ;;  %v61_v15 = vld [vmem:[#allocation5 + $0x20] sm:$0xff] }
  0x10   :  { %123 = vperm.xlu0 %642, %v56_v3   ;;  %267 = vperm.xlu2 %646, %v56_v3   ;;  %v62_v16 = vld [vmem:[#allocation5 + $0x28] sm:$0xff]  ;;  %v63_v17 = vld [vmem:[#allocation5 + $0x30] sm:$0xff]  ;;  %v64_v18 = vld [vmem:[#allocation5 + $0x38] sm:$0xff]  ;;  %v89_v25 = vmul.f32 2.0, %v57_v11  ;;  %v90_v29 = vmul.f32 2.0, %v58_v12  ;;  %v91_v30 = vmul.f32 2.0, %v59_v13 }
  0x11   :  { %v65_v19 = vld [vmem:[#allocation5 + $0x40] sm:$0xff]  ;;  %v66_v20 = vld [vmem:[#allocation5 + $0x48] sm:$0xff]  ;;  %v67_v22 = vld [vmem:[#allocation5 + $0x50] sm:$0xff]  ;;  %v92_v31 = vmul.f32 2.0, %v60_v14  ;;  %v93_v32 = vmul.f32 2.0, %v61_v15  ;;  %v94_v33 = vmul.f32 2.0, %v62_v16 }
  0x12   :  { %v68_v23 = vld [vmem:[#allocation5 + $0x58] sm:$0xff]  ;;  %v69_v24 = vld [vmem:[#allocation5 + $0x60] sm:$0xff]  ;;  %v70_v26 = vld [vmem:[#allocation5 + $0x68] sm:$0xff]  ;;  %v95_v34 = vmul.f32 2.0, %v63_v17  ;;  %v96_v35 = vmul.f32 2.0, %v64_v18  ;;  %v97_v36 = vmul.f32 2.0, %v65_v19 }
  0x13   :  { %v71_v27 = vld [vmem:[#allocation5 + $0x70] sm:$0xff]  ;;  %v72_v28 = vld [vmem:[#allocation5 + $0x78] sm:$0xff]  ;;  %v98_v37 = vmul.f32 2.0, %v66_v20  ;;  %v99_v38 = vmul.f32 2.0, %v67_v22  ;;  %v100_v39 = vmul.f32 2.0, %v68_v23  ;;  %v101_v40 = vmul.f32 2.0, %v69_v24 }
  0x14   :  { %v102_v41 = vmul.f32 2.0, %v70_v26  ;;  %v103_v42 = vmul.f32 2.0, %v71_v27  ;;  %v104_v43 = vmul.f32 2.0, %v72_v28  ;;  %v612_v44 = vadd.f32 -1.0, %v89_v25  ;;  %v832_v56 = vld [vmem:[#allocation7] sm:$0xff]  ;;  %v834_v61 = vld [vmem:[#allocation7 + $0x8] sm:$0xff] }
  0x15   :  { %v613_v45 = vadd.f32 -1.0, %v90_v29  ;;  %v614_v46 = vadd.f32 -1.0, %v91_v30  ;;  %v615_v47 = vadd.f32 -1.0, %v92_v31  ;;  %v616_v48 = vadd.f32 -1.0, %v93_v32  ;;  %1170 = vst [vmem:[#allocation12_spill] sm:$0xff] %v832_v56  ;;  %v836_v62 = vld [vmem:[#allocation7 + $0x10] sm:$0xff] }
  0x16   :  { %v617_v49 = vadd.f32 -1.0, %v94_v33  ;;  %v618_v50 = vadd.f32 -1.0, %v95_v34  ;;  %v619_v51 = vadd.f32 -1.0, %v96_v35  ;;  %v620_v52 = vadd.f32 -1.0, %v97_v36  ;;  %1171 = vst [vmem:[#allocation13_spill] sm:$0xff] %v834_v61  ;;  %v838_v63 = vld [vmem:[#allocation7 + $0x18] sm:$0xff] }
  0x17   :  { %645 = vset.pattern.permute.xlu1 %v793_v4  ;;  %v621_v53 = vadd.f32 -1.0, %v98_v37  ;;  %v622_v54 = vadd.f32 -1.0, %v99_v38  ;;  %v623_v55 = vadd.f32 -1.0, %v100_v39  ;;  %v624_v57 = vadd.f32 -1.0, %v101_v40  ;;  %1172 = vst [vmem:[#allocation14_spill] sm:$0xff] %v836_v62  ;;  %v854_v12 = vld [vmem:[#allocation7 + $0x38] sm:$0xff] }
  0x18   :  { %643 = vset.pattern.permute.xlu0 %v794_v5  ;;  %215 = vperm.xlu1 %645, %v56_v3   ;;  %v625_v58 = vadd.f32 -1.0, %v102_v41  ;;  %v626_v59 = vadd.f32 -1.0, %v103_v42  ;;  %v627_v60 = vadd.f32 -1.0, %v104_v43  ;;  %1173 = vst [vmem:[#allocation15_spill] sm:$0xff] %v838_v63  ;;  %v844_v5 = vld [vmem:[#allocation7 + $0x20] sm:$0xff]  ;;  %v858_v14 = vld [vmem:[#allocation7 + $0x48] sm:$0xff] }
  0x19   :  { %143 = vperm.xlu0 %643, %v56_v3   ;;  %647 = vset.pattern.permute.xlu2 %v795_v6  ;;  %1174 = vst [vmem:[#allocation16_spill] sm:$0xff] %v844_v5  ;;  %v846_v6 = vld [vmem:[#allocation7 + $0x28] sm:$0xff]  ;;  %v856_v13 = vld [vmem:[#allocation7 + $0x40] sm:$0xff]  ;;  %v864_v19 = vld [vmem:[#allocation7 + $0x50] sm:$0xff]  ;;  %s800_s0 = smov [#allocation8]   ;;  %s601_s28 = sshll.u32 %s1143_s3, 4  ;;  %s602_s28 = int_to_ptr.hbm [resolvable:$true] %s601_s28 }
  0x1a   :  { %319 = vperm.xlu2 %647, %v56_v3   ;;  %1175 = vst [vmem:[#allocation17_spill] sm:$0xff] %v846_v6  ;;  %v866_v20 = vld [vmem:[#allocation7 + $0x58] sm:$0xff]  ;;  %v868_v22 = vld [vmem:[#allocation7 + $0x60] sm:$0xff]  ;;  %v874_v27 = vld [vmem:[#allocation7 + $0x68] sm:$0xff]  ;;  %s599_s2 = sshll.u32 %s800_s0, 4  ;;  %s600_s2 = int_to_ptr.vmem [resolvable:$true] %s599_s2 }
  0x1b   :  { %1177 = vst [vmem:[#allocation19_spill] sm:$0xff] %v854_v12  ;;  %v876_v28 = vld [vmem:[#allocation7 + $0x70] sm:$0xff]  ;;  %v878_v29 = vld [vmem:[#allocation7 + $0x78] sm:$0xff] }
  0x1c   :  { %1178 = vst [vmem:[#allocation20_spill] sm:$0xff] %v856_v13 }
  0x1d   :  { %1179 = vst [vmem:[#allocation21_spill] sm:$0xff] %v858_v14 }
  0x1e   :  { %1180 = vst [vmem:[#allocation22_spill] sm:$0xff] %v864_v19 }
  0x1f   :  { %1181 = vst [vmem:[#allocation23_spill] sm:$0xff] %v866_v20 }
  0x20   :  { %648 = vset.pattern.permute.xlu1 %v796_v7  ;;  %v848_v7 = vld [vmem:[#allocation7 + $0x30] sm:$0xff]  ;;  %1182 = vst [vmem:[#allocation24_spill] sm:$0xff] %v868_v22 }
  0x21   :  { %650 = vset.pattern.permute.xlu0 %v797_v8  ;;  %371 = vperm.xlu1 %648, %v56_v3   ;;  %1176 = vst [vmem:[#allocation18_spill] sm:$0xff] %v848_v7 }
  0x22   :  { %475 = vperm.xlu0 %650, %v56_v3   ;;  %649 = vset.pattern.permute.xlu2 %v798_v9  ;;  %1183 = vst [vmem:[#allocation25_spill] sm:$0xff] %v874_v27 }
  0x23   :  { %423 = vperm.xlu2 %649, %v56_v3   ;;  %1184 = vst [vmem:[#allocation26_spill] sm:$0xff] %v876_v28 }
  0x24   :  { %1185 = vst [vmem:[#allocation27_spill] sm:$0xff] %v878_v29 }
  0x29   :  { %651 = vset.pattern.permute.xlu1 %v799_v10 }
  0x2a   :  { %652 = vset.pattern.permute.xlu0 %v799_v10  ;;  %511 = vperm.xlu1 %651, %v56_v3  }
  0x82   :  { %v830_v21 = vpop.permute.xlu0 %123 }
  0x83   :  { %v126_v0 = vmul.f32 %v612_v44, %v830_v21  ;;  %v127_v1 = vmul.f32 %v613_v45, %v830_v21  ;;  %v128_v2 = vmul.f32 %v614_v46, %v830_v21  ;;  %v129_v3 = vmul.f32 %v615_v47, %v830_v21 }
  0x84   :  { %v130_v8 = vmul.f32 %v616_v48, %v830_v21  ;;  %v131_v9 = vmul.f32 %v617_v49, %v830_v21  ;;  %v132_v10 = vmul.f32 %v618_v50, %v830_v21  ;;  %v133_v11 = vmul.f32 %v619_v51, %v830_v21  ;;  %v180_v49 = vpop.permute.xlu1 %179 }
  0x85   :  { %v134_v15 = vmul.f32 %v620_v52, %v830_v21  ;;  %v135_v16 = vmul.f32 %v621_v53, %v830_v21  ;;  %v136_v17 = vmul.f32 %v622_v54, %v830_v21  ;;  %v137_v18 = vmul.f32 %v623_v55, %v830_v21 }
  0x86   :  { %v138_v23 = vmul.f32 %v624_v57, %v830_v21  ;;  %v139_v24 = vmul.f32 %v625_v58, %v830_v21  ;;  %v140_v25 = vmul.f32 %v626_v59, %v830_v21  ;;  %v141_v26 = vmul.f32 %v627_v60, %v830_v21 }
  0x8b   :  { %v144_v4 = vpop.permute.xlu0 %143 }
  0x8c   :  { %v146_v30 = vmul.f32 %v144_v4, %v832_v56  ;;  %v147_v31 = vmul.f32 %v144_v4, %v834_v61  ;;  %v148_v32 = vmul.f32 %v144_v4, %v836_v62  ;;  %v149_v33 = vmul.f32 %v144_v4, %v838_v63 }
  0x8d   :  { %v150_v34 = vmul.f32 %v144_v4, %v844_v5  ;;  %v151_v35 = vmul.f32 %v144_v4, %v846_v6  ;;  %v152_v21 = vmul.f32 %v144_v4, %v848_v7  ;;  %v153_v36 = vmul.f32 %v144_v4, %v854_v12 }
  0x8e   :  { %v154_v37 = vmul.f32 %v144_v4, %v856_v13  ;;  %v155_v38 = vmul.f32 %v144_v4, %v858_v14  ;;  %v156_v39 = vmul.f32 %v144_v4, %v864_v19  ;;  %v157_v40 = vmul.f32 %v144_v4, %v866_v20 }
  0x8f   :  { %v158_v41 = vmul.f32 %v144_v4, %v868_v22  ;;  %v159_v42 = vmul.f32 %v144_v4, %v874_v27  ;;  %v160_v43 = vmul.f32 %v144_v4, %v876_v28  ;;  %v161_v44 = vmul.f32 %v144_v4, %v878_v29 }
  0x90   :  { %v896_v45 = vadd.f32 %v146_v30, %v126_v0  ;;  %v898_v46 = vadd.f32 %v147_v31, %v127_v1  ;;  %v900_v47 = vadd.f32 %v148_v32, %v128_v2  ;;  %v902_v48 = vadd.f32 %v149_v33, %v129_v3 }
  0x91   :  { %v904_v50 = vadd.f32 %v150_v34, %v130_v8  ;;  %v906_v51 = vadd.f32 %v151_v35, %v131_v9  ;;  %v908_v52 = vadd.f32 %v152_v21, %v132_v10  ;;  %v910_v53 = vadd.f32 %v153_v36, %v133_v11 }
  0x92   :  { %v912_v54 = vadd.f32 %v154_v37, %v134_v15  ;;  %v914_v55 = vadd.f32 %v155_v38, %v135_v16  ;;  %v916_v57 = vadd.f32 %v156_v39, %v136_v17  ;;  %v918_v58 = vadd.f32 %v157_v40, %v137_v18 }
  0x93   :  { %v920_v59 = vadd.f32 %v158_v41, %v138_v23  ;;  %v922_v60 = vadd.f32 %v159_v42, %v139_v24  ;;  %v924_v0 = vadd.f32 %v160_v43, %v140_v25  ;;  %v926_v1 = vadd.f32 %v161_v44, %v141_v26  ;;  %v216_v42 = vpop.permute.xlu1 %215 }
  0x94   :  { %1186 = vst [vmem:[#allocation28_spill] sm:$0xff] %v918_v58  ;;  %v182_v2 = vmul.f32 %v180_v49, %v896_v45  ;;  %v183_v3 = vmul.f32 %v180_v49, %v898_v46  ;;  %v184_v4 = vmul.f32 %v180_v49, %v900_v47  ;;  %v185_v8 = vmul.f32 %v180_v49, %v902_v48 }
  0x95   :  { %1187 = vst [vmem:[#allocation29_spill] sm:$0xff] %v920_v59  ;;  %v186_v9 = vmul.f32 %v180_v49, %v904_v50  ;;  %v187_v10 = vmul.f32 %v180_v49, %v906_v51  ;;  %v188_v11 = vmul.f32 %v180_v49, %v908_v52  ;;  %v189_v15 = vmul.f32 %v180_v49, %v910_v53 }
  0x96   :  { %1188 = vst [vmem:[#allocation30_spill] sm:$0xff] %v922_v60  ;;  %v190_v16 = vmul.f32 %v180_v49, %v912_v54  ;;  %v191_v17 = vmul.f32 %v180_v49, %v914_v55  ;;  %v192_v18 = vmul.f32 %v180_v49, %v916_v57  ;;  %v193_v23 = vmul.f32 %v180_v49, %v918_v58 }
  0x97   :  { %1189 = vst [vmem:[#allocation31_spill] sm:$0xff] %v924_v0  ;;  %v194_v24 = vmul.f32 %v180_v49, %v920_v59  ;;  %v195_v25 = vmul.f32 %v180_v49, %v922_v60  ;;  %v196_v26 = vmul.f32 %v180_v49, %v924_v0  ;;  %v197_v30 = vmul.f32 %v180_v49, %v926_v1 }
  0x98   :  { %1190 = vst [vmem:[#allocation32_spill] sm:$0xff] %v926_v1  ;;  %v198_v31 = vrot.slane %v896_v45, 1  ;;  %v199_v32 = vrot.slane %v898_v46, 1  ;;  %v200_v33 = vrot.slane %v900_v47, 1  ;;  %v201_v34 = vrot.slane %v902_v48, 1 }
  0x99   :  { %v202_v35 = vrot.slane %v904_v50, 1  ;;  %v203_v21 = vrot.slane %v906_v51, 1  ;;  %v204_v36 = vrot.slane %v908_v52, 1  ;;  %v205_v37 = vrot.slane %v910_v53, 1 }
  0x9a   :  { %v206_v38 = vrot.slane %v912_v54, 1  ;;  %v207_v39 = vrot.slane %v914_v55, 1  ;;  %v208_v40 = vrot.slane %v916_v57, 1  ;;  %v209_v41 = vrot.slane %v918_v58, 1 }
  0x9b   :  { %v210_v43 = vrot.slane %v920_v59, 1  ;;  %v211_v44 = vrot.slane %v922_v60, 1  ;;  %v212_v49 = vrot.slane %v924_v0, 1  ;;  %v213_v29 = vrot.slane %v926_v1, 1 }
  0x9c   :  { %v218_v28 = vmul.f32 %v216_v42, %v198_v31  ;;  %v219_v27 = vmul.f32 %v216_v42, %v199_v32  ;;  %v220_v22 = vmul.f32 %v216_v42, %v200_v33  ;;  %v221_v20 = vmul.f32 %v216_v42, %v201_v34 }
  0x9d   :  { %v222_v19 = vmul.f32 %v216_v42, %v202_v35  ;;  %v223_v14 = vmul.f32 %v216_v42, %v203_v21  ;;  %v224_v13 = vmul.f32 %v216_v42, %v204_v36  ;;  %v225_v12 = vmul.f32 %v216_v42, %v205_v37 }
  0x9e   :  { %v226_v7 = vmul.f32 %v216_v42, %v206_v38  ;;  %v227_v6 = vmul.f32 %v216_v42, %v207_v39  ;;  %v228_v5 = vmul.f32 %v216_v42, %v208_v40  ;;  %v229_v63 = vmul.f32 %v216_v42, %v209_v41 }
  0x9f   :  { %v230_v62 = vmul.f32 %v216_v42, %v210_v43  ;;  %v231_v61 = vmul.f32 %v216_v42, %v211_v44  ;;  %v232_v56 = vmul.f32 %v216_v42, %v212_v49  ;;  %v233_v60 = vmul.f32 %v216_v42, %v213_v29 }
  0xa0   :  { %v234_v59 = vadd.f32 %v218_v28, %v182_v2  ;;  %v235_v0 = vadd.f32 %v219_v27, %v183_v3  ;;  %v236_v58 = vadd.f32 %v220_v22, %v184_v4  ;;  %v237_v1 = vadd.f32 %v221_v20, %v185_v8  ;;  %v1193_v28 = vld [vmem:[#allocation30_spill] sm:$0xff]  ;;  %v1194_v2 = vld [vmem:[#allocation31_spill] sm:$0xff]  ;;  %v1195_v4 = vld [vmem:[#allocation32_spill] sm:$0xff] }
  0xa1   :  { %v238_v31 = vadd.f32 %v222_v19, %v186_v9  ;;  %v239_v32 = vadd.f32 %v223_v14, %v187_v10  ;;  %v240_v33 = vadd.f32 %v224_v13, %v188_v11  ;;  %v241_v34 = vadd.f32 %v225_v12, %v189_v15  ;;  %v268_v13 = vpop.permute.xlu2 %267  ;;  %v1192_v19 = vld [vmem:[#allocation29_spill] sm:$0xff] }
  0xa2   :  { %v242_v35 = vadd.f32 %v226_v7, %v190_v16  ;;  %v243_v21 = vadd.f32 %v227_v6, %v191_v17  ;;  %v244_v36 = vadd.f32 %v228_v5, %v192_v18  ;;  %v245_v37 = vadd.f32 %v229_v63, %v193_v23  ;;  %v1191_v5 = vld [vmem:[#allocation28_spill] sm:$0xff] }
  0xa3   :  { %v246_v38 = vadd.f32 %v230_v62, %v194_v24  ;;  %v247_v39 = vadd.f32 %v231_v61, %v195_v25  ;;  %v248_v40 = vadd.f32 %v232_v56, %v196_v26  ;;  %v249_v41 = vadd.f32 %v233_v60, %v197_v30 }
  0xa4   :  { %v250_v43 = vrot.slane %v896_v45, 5  ;;  %v251_v29 = vrot.slane %v898_v46, 5  ;;  %v252_v27 = vrot.slane %v900_v47, 5  ;;  %v253_v20 = vrot.slane %v902_v48, 5 }
  0xa5   :  { %v254_v14 = vrot.slane %v904_v50, 5  ;;  %v255_v12 = vrot.slane %v906_v51, 5  ;;  %v256_v6 = vrot.slane %v908_v52, 5  ;;  %v257_v63 = vrot.slane %v910_v53, 5 }
  0xa6   :  { %v258_v61 = vrot.slane %v912_v54, 5  ;;  %v259_v56 = vrot.slane %v914_v55, 5  ;;  %v260_v62 = vrot.slane %v916_v57, 5  ;;  %v261_v7 = vrot.slane %v1191_v5, 5 }
  0xa7   :  { %v262_v22 = vrot.slane %v1192_v19, 5  ;;  %v263_v60 = vrot.slane %v1193_v28, 5  ;;  %v264_v3 = vrot.slane %v1194_v2, 5  ;;  %v265_v8 = vrot.slane %v1195_v4, 5 }
  0xa8   :  { %v270_v9 = vmul.f32 %v268_v13, %v250_v43  ;;  %v271_v10 = vmul.f32 %v268_v13, %v251_v29  ;;  %v272_v11 = vmul.f32 %v268_v13, %v252_v27  ;;  %v273_v15 = vmul.f32 %v268_v13, %v253_v20 }
  0xa9   :  { %v274_v16 = vmul.f32 %v268_v13, %v254_v14  ;;  %v275_v17 = vmul.f32 %v268_v13, %v255_v12  ;;  %v276_v18 = vmul.f32 %v268_v13, %v256_v6  ;;  %v277_v23 = vmul.f32 %v268_v13, %v257_v63 }
  0xaa   :  { %v278_v24 = vmul.f32 %v268_v13, %v258_v61  ;;  %v279_v25 = vmul.f32 %v268_v13, %v259_v56  ;;  %v280_v26 = vmul.f32 %v268_v13, %v260_v62  ;;  %v281_v30 = vmul.f32 %v268_v13, %v261_v7 }
  0xab   :  { %v282_v42 = vmul.f32 %v268_v13, %v262_v22  ;;  %v283_v44 = vmul.f32 %v268_v13, %v263_v60  ;;  %v284_v49 = vmul.f32 %v268_v13, %v264_v3  ;;  %v285_v28 = vmul.f32 %v268_v13, %v265_v8  ;;  %v1200_v3 = vld [vmem:[#allocation32_spill] sm:$0xff] }
  0xac   :  { %v286_v19 = vadd.f32 %v270_v9, %v234_v59  ;;  %v287_v2 = vadd.f32 %v271_v10, %v235_v0  ;;  %v288_v5 = vadd.f32 %v272_v11, %v236_v58  ;;  %v289_v4 = vadd.f32 %v273_v15, %v237_v1 }
  0xad   :  { %v290_v43 = vadd.f32 %v274_v16, %v238_v31  ;;  %v291_v29 = vadd.f32 %v275_v17, %v239_v32  ;;  %v292_v27 = vadd.f32 %v276_v18, %v240_v33  ;;  %v293_v20 = vadd.f32 %v277_v23, %v241_v34 }
  0xae   :  { %v294_v14 = vadd.f32 %v278_v24, %v242_v35  ;;  %v295_v12 = vadd.f32 %v279_v25, %v243_v21  ;;  %v296_v6 = vadd.f32 %v280_v26, %v244_v36  ;;  %v297_v63 = vadd.f32 %v281_v30, %v245_v37  ;;  %v1196_v21 = vld [vmem:[#allocation28_spill] sm:$0xff]  ;;  %v320_v37 = vpop.permute.xlu2 %319 }
  0xaf   :  { %v298_v61 = vadd.f32 %v282_v42, %v246_v38  ;;  %v299_v56 = vadd.f32 %v283_v44, %v247_v39  ;;  %v300_v62 = vadd.f32 %v284_v49, %v248_v40  ;;  %v301_v7 = vadd.f32 %v285_v28, %v249_v41  ;;  %v1197_v38 = vld [vmem:[#allocation29_spill] sm:$0xff]  ;;  %v1198_v40 = vld [vmem:[#allocation30_spill] sm:$0xff]  ;;  %v1199_v28 = vld [vmem:[#allocation31_spill] sm:$0xff] }
  0xb0   :  { %v302_v22 = vrot.slane %v896_v45, 2  ;;  %v303_v13 = vrot.slane %v898_v46, 2  ;;  %v304_v59 = vrot.slane %v900_v47, 2  ;;  %v305_v58 = vrot.slane %v902_v48, 2 }
  0xb1   :  { %v306_v0 = vrot.slane %v904_v50, 2  ;;  %v307_v1 = vrot.slane %v906_v51, 2  ;;  %v308_v31 = vrot.slane %v908_v52, 2  ;;  %v309_v32 = vrot.slane %v910_v53, 2 }
  0xb2   :  { %v310_v33 = vrot.slane %v912_v54, 2  ;;  %v311_v34 = vrot.slane %v914_v55, 2  ;;  %v312_v35 = vrot.slane %v916_v57, 2  ;;  %v313_v36 = vrot.slane %v1196_v21, 2 }
  0xb3   :  { %v314_v39 = vrot.slane %v1197_v38, 2  ;;  %v315_v41 = vrot.slane %v1198_v40, 2  ;;  %v316_v60 = vrot.slane %v1199_v28, 2  ;;  %v317_v8 = vrot.slane %v1200_v3, 2 }
  0xb4   :  { %v322_v9 = vmul.f32 %v320_v37, %v302_v22  ;;  %v323_v10 = vmul.f32 %v320_v37, %v303_v13  ;;  %v324_v11 = vmul.f32 %v320_v37, %v304_v59  ;;  %v325_v15 = vmul.f32 %v320_v37, %v305_v58 }
  0xb5   :  { %v326_v16 = vmul.f32 %v320_v37, %v306_v0  ;;  %v327_v17 = vmul.f32 %v320_v37, %v307_v1  ;;  %v328_v18 = vmul.f32 %v320_v37, %v308_v31  ;;  %v329_v23 = vmul.f32 %v320_v37, %v309_v32 }
  0xb6   :  { %v330_v24 = vmul.f32 %v320_v37, %v310_v33  ;;  %v331_v25 = vmul.f32 %v320_v37, %v311_v34  ;;  %v332_v26 = vmul.f32 %v320_v37, %v312_v35  ;;  %v333_v30 = vmul.f32 %v320_v37, %v313_v36 }
  0xb7   :  { %v334_v42 = vmul.f32 %v320_v37, %v314_v39  ;;  %v335_v44 = vmul.f32 %v320_v37, %v315_v41  ;;  %v336_v49 = vmul.f32 %v320_v37, %v316_v60  ;;  %v337_v40 = vmul.f32 %v320_v37, %v317_v8  ;;  %v1205_v60 = vld [vmem:[#allocation32_spill] sm:$0xff] }
  0xb8   :  { %v338_v38 = vadd.f32 %v322_v9, %v286_v19  ;;  %v339_v28 = vadd.f32 %v323_v10, %v287_v2  ;;  %v340_v21 = vadd.f32 %v324_v11, %v288_v5  ;;  %v341_v3 = vadd.f32 %v325_v15, %v289_v4  ;;  %v372_v2 = vpop.permute.xlu1 %371 }
  0xb9   :  { %v342_v22 = vadd.f32 %v326_v16, %v290_v43  ;;  %v343_v13 = vadd.f32 %v327_v17, %v291_v29  ;;  %v344_v59 = vadd.f32 %v328_v18, %v292_v27  ;;  %v345_v58 = vadd.f32 %v329_v23, %v293_v20 }
  0xba   :  { %v346_v0 = vadd.f32 %v330_v24, %v294_v14  ;;  %v347_v1 = vadd.f32 %v331_v25, %v295_v12  ;;  %v348_v31 = vadd.f32 %v332_v26, %v296_v6  ;;  %v349_v32 = vadd.f32 %v333_v30, %v297_v63  ;;  %v1201_v6 = vld [vmem:[#allocation28_spill] sm:$0xff] }
  0xbb   :  { %v350_v33 = vadd.f32 %v334_v42, %v298_v61  ;;  %v351_v34 = vadd.f32 %v335_v44, %v299_v56  ;;  %v352_v35 = vadd.f32 %v336_v49, %v300_v62  ;;  %v353_v36 = vadd.f32 %v337_v40, %v301_v7  ;;  %v1202_v61 = vld [vmem:[#allocation29_spill] sm:$0xff]  ;;  %v1203_v62 = vld [vmem:[#allocation30_spill] sm:$0xff]  ;;  %v1204_v40 = vld [vmem:[#allocation31_spill] sm:$0xff] }
  0xbc   :  { %v354_v39 = vrot.slane %v896_v45, 6  ;;  %v355_v37 = vrot.slane %v898_v46, 6  ;;  %v356_v19 = vrot.slane %v900_v47, 6  ;;  %v357_v5 = vrot.slane %v902_v48, 6 }
  0xbd   :  { %v358_v4 = vrot.slane %v904_v50, 6  ;;  %v359_v43 = vrot.slane %v906_v51, 6  ;;  %v360_v29 = vrot.slane %v908_v52, 6  ;;  %v361_v27 = vrot.slane %v910_v53, 6 }
  0xbe   :  { %v362_v20 = vrot.slane %v912_v54, 6  ;;  %v363_v14 = vrot.slane %v914_v55, 6  ;;  %v364_v12 = vrot.slane %v916_v57, 6  ;;  %v365_v63 = vrot.slane %v1201_v6, 6 }
  0xbf   :  { %v366_v56 = vrot.slane %v1202_v61, 6  ;;  %v367_v7 = vrot.slane %v1203_v62, 6  ;;  %v368_v41 = vrot.slane %v1204_v40, 6  ;;  %v369_v8 = vrot.slane %v1205_v60, 6 }
  0xc0   :  { %v374_v9 = vmul.f32 %v372_v2, %v354_v39  ;;  %v375_v10 = vmul.f32 %v372_v2, %v355_v37  ;;  %v376_v11 = vmul.f32 %v372_v2, %v356_v19  ;;  %v377_v15 = vmul.f32 %v372_v2, %v357_v5 }
  0xc1   :  { %v378_v16 = vmul.f32 %v372_v2, %v358_v4  ;;  %v379_v17 = vmul.f32 %v372_v2, %v359_v43  ;;  %v380_v18 = vmul.f32 %v372_v2, %v360_v29  ;;  %v381_v23 = vmul.f32 %v372_v2, %v361_v27 }
  0xc2   :  { %v382_v24 = vmul.f32 %v372_v2, %v362_v20  ;;  %v383_v25 = vmul.f32 %v372_v2, %v363_v14  ;;  %v384_v26 = vmul.f32 %v372_v2, %v364_v12  ;;  %v385_v30 = vmul.f32 %v372_v2, %v365_v63  ;;  %v1207_v14 = vld [vmem:[#allocation29_spill] sm:$0xff]  ;;  %v1208_v63 = vld [vmem:[#allocation30_spill] sm:$0xff] }
  0xc3   :  { %v386_v42 = vmul.f32 %v372_v2, %v366_v56  ;;  %v387_v44 = vmul.f32 %v372_v2, %v367_v7  ;;  %v388_v49 = vmul.f32 %v372_v2, %v368_v41  ;;  %v389_v62 = vmul.f32 %v372_v2, %v369_v8  ;;  %v1044_v8 = vpop.permute.xlu0 %475 }
  0xc4   :  { %v390_v61 = vadd.f32 %v374_v9, %v338_v38  ;;  %v391_v40 = vadd.f32 %v375_v10, %v339_v28  ;;  %v392_v6 = vadd.f32 %v376_v11, %v340_v21  ;;  %v393_v60 = vadd.f32 %v377_v15, %v341_v3  ;;  %v1025_v28 = vpop.permute.xlu2 %423  ;;  %v1210_v9 = vld [vmem:[#allocation32_spill] sm:$0xff] }
  0xc5   :  { %v394_v39 = vadd.f32 %v378_v16, %v342_v22  ;;  %v395_v37 = vadd.f32 %v379_v17, %v343_v13  ;;  %v396_v19 = vadd.f32 %v380_v18, %v344_v59  ;;  %v1008_v5 = vadd.f32 %v381_v23, %v345_v58 }
  0xc6   :  { %v1010_v4 = vadd.f32 %v382_v24, %v346_v0  ;;  %v1012_v43 = vadd.f32 %v383_v25, %v347_v1  ;;  %v1014_v29 = vadd.f32 %v384_v26, %v348_v31  ;;  %v1016_v27 = vadd.f32 %v385_v30, %v349_v32 }
  0xc7   :  { %v1018_v20 = vadd.f32 %v386_v42, %v350_v33  ;;  %v1020_v2 = vadd.f32 %v387_v44, %v351_v34  ;;  %v1022_v38 = vadd.f32 %v388_v49, %v352_v35  ;;  %v406_v21 = vrot.slane %v896_v45, 3  ;;  %v1206_v35 = vld [vmem:[#allocation28_spill] sm:$0xff] }
  0xc8   :  { %v1027_v3 = vadd.f32 %v389_v62, %v353_v36  ;;  %v407_v22 = vrot.slane %v898_v46, 3  ;;  %v408_v13 = vrot.slane %v900_v47, 3  ;;  %v409_v59 = vrot.slane %v902_v48, 3  ;;  %v1209_v62 = vld [vmem:[#allocation31_spill] sm:$0xff] }
  0xc9   :  { %v410_v58 = vrot.slane %v904_v50, 3  ;;  %v411_v0 = vrot.slane %v906_v51, 3  ;;  %v412_v1 = vrot.slane %v908_v52, 3  ;;  %v413_v31 = vrot.slane %v910_v53, 3 }
  0xca   :  { %v414_v32 = vrot.slane %v912_v54, 3  ;;  %v415_v33 = vrot.slane %v914_v55, 3  ;;  %v416_v34 = vrot.slane %v916_v57, 3  ;;  %v417_v36 = vrot.slane %v1206_v35, 3 }
  0xcb   :  { %v418_v12 = vrot.slane %v1207_v14, 3  ;;  %v419_v56 = vrot.slane %v1208_v63, 3  ;;  %v420_v7 = vrot.slane %v1209_v62, 3  ;;  %v426_v41 = vmul.f32 %v1025_v28, %v406_v21 }
  0xcc   :  { %v421_v10 = vrot.slane %v1210_v9, 3  ;;  %v427_v11 = vmul.f32 %v1025_v28, %v407_v22  ;;  %v428_v15 = vmul.f32 %v1025_v28, %v408_v13  ;;  %v429_v16 = vmul.f32 %v1025_v28, %v409_v59 }
  0xcd   :  { %v430_v17 = vmul.f32 %v1025_v28, %v410_v58  ;;  %v431_v18 = vmul.f32 %v1025_v28, %v411_v0  ;;  %v442_v23 = vadd.f32 %v426_v41, %v390_v61  ;;  %v458_v24 = vrot.slane %v896_v45, 7 }
  0xce   :  { %v432_v25 = vmul.f32 %v1025_v28, %v412_v1  ;;  %v433_v26 = vmul.f32 %v1025_v28, %v413_v31  ;;  %v443_v30 = vadd.f32 %v427_v11, %v391_v40  ;;  %v459_v42 = vrot.slane %v898_v46, 7  ;;  %v1064_v1 = vpop.permute.xlu1 %511 }
  0xcf   :  { %v434_v44 = vmul.f32 %v1025_v28, %v414_v32  ;;  %v444_v49 = vadd.f32 %v428_v15, %v392_v6  ;;  %v460_v21 = vrot.slane %v900_v47, 7  ;;  %v478_v22 = vmul.f32 %v1044_v8, %v458_v24 }
  0xd0   :  { %v435_v13 = vmul.f32 %v1025_v28, %v415_v33  ;;  %v445_v59 = vadd.f32 %v429_v16, %v393_v60  ;;  %v461_v61 = vrot.slane %v902_v48, 7  ;;  %v479_v45 = vmul.f32 %v1044_v8, %v459_v42 }
  0xd1   :  { %v446_v58 = vadd.f32 %v430_v17, %v394_v39  ;;  %v462_v0 = vrot.slane %v904_v50, 7  ;;  %v480_v40 = vmul.f32 %v1044_v8, %v460_v21  ;;  %v494_v46 = vadd.f32 %v478_v22, %v442_v23 }
  0xd2   :  { %v447_v6 = vadd.f32 %v431_v18, %v395_v37  ;;  %v463_v47 = vrot.slane %v906_v51, 7  ;;  %v481_v31 = vmul.f32 %v1044_v8, %v461_v61  ;;  %v495_v32 = vadd.f32 %v479_v45, %v443_v30 }
  0xd3   :  { %v436_v60 = vmul.f32 %v1025_v28, %v416_v34  ;;  %v437_v48 = vmul.f32 %v1025_v28, %v417_v36  ;;  %v482_v33 = vmul.f32 %v1044_v8, %v462_v0  ;;  %v496_v39 = vadd.f32 %v480_v40, %v444_v49 }
  0xd4   :  { %v448_v41 = vadd.f32 %v432_v25, %v396_v19  ;;  %v464_v50 = vrot.slane %v908_v52, 7  ;;  %v483_v11 = vmul.f32 %v1044_v8, %v463_v47  ;;  %v497_v15 = vadd.f32 %v481_v31, %v445_v59 }
  0xd5   :  { %v438_v37 = vmul.f32 %v1025_v28, %v418_v12  ;;  %v449_v51 = vadd.f32 %v433_v26, %v1008_v5  ;;  %v498_v16 = vadd.f32 %v482_v33, %v446_v58  ;;  %v514_v17 = vadd.f32 %v1064_v1, %v494_v46  ;;  %v1211_v46 = vld [vmem:[#allocation12_spill] sm:$0xff]  ;;  %v1213_v33 = vld [vmem:[#allocation14_spill] sm:$0xff] }
  0xd6   :  { %v465_v34 = vrot.slane %v910_v53, 7  ;;  %v484_v36 = vmul.f32 %v1044_v8, %v464_v50  ;;  %v499_v18 = vadd.f32 %v483_v11, %v447_v6  ;;  %v515_v23 = vadd.f32 %v1064_v1, %v495_v32 }
  0xd7   :  { %v439_v19 = vmul.f32 %v1025_v28, %v419_v56  ;;  %v440_v52 = vmul.f32 %v1025_v28, %v420_v7  ;;  %v450_v24 = vadd.f32 %v434_v44, %v1010_v4  ;;  %v516_v12 = vadd.f32 %v1064_v1, %v496_v39 }
  0xd8   :  { %v466_v5 = vrot.slane %v912_v54, 7  ;;  %v485_v25 = vmul.f32 %v1044_v8, %v465_v34  ;;  %v500_v26 = vadd.f32 %v484_v36, %v448_v41  ;;  %v517_v53 = vadd.f32 %v1064_v1, %v497_v15 }
  0xd9   :  { %v451_v30 = vadd.f32 %v435_v13, %v1012_v43  ;;  %v467_v42 = vrot.slane %v914_v55, 7  ;;  %v518_v49 = vadd.f32 %v1064_v1, %v498_v16  ;;  %653 = vtanh.f32 %v514_v17 }
  0xda   :  { %v486_v56 = vmul.f32 %v1044_v8, %v466_v5  ;;  %v501_v7 = vadd.f32 %v485_v25, %v449_v51  ;;  %v519_v4 = vadd.f32 %v1064_v1, %v499_v18  ;;  %655 = vtanh.f32 %v515_v23  ;;  %v1215_v23 = vld [vmem:[#allocation16_spill] sm:$0xff]  ;;  %v1216_v25 = vld [vmem:[#allocation17_spill] sm:$0xff] }
  0xdb   :  { %v441_v54 = vmul.f32 %v1025_v28, %v421_v10  ;;  %v452_v44 = vadd.f32 %v436_v60, %v1014_v29  ;;  %v468_v21 = vrot.slane %v916_v57, 7  ;;  %657 = vtanh.f32 %v516_v12 }
  0xdc   :  { %v487_v43 = vmul.f32 %v1044_v8, %v467_v42  ;;  %v502_v22 = vadd.f32 %v486_v56, %v450_v24  ;;  %v520_v55 = vadd.f32 %v1064_v1, %v500_v26  ;;  %659 = vtanh.f32 %v517_v53 }
  0xdd   :  { %v453_v13 = vadd.f32 %v437_v48, %v1016_v27  ;;  %v454_v59 = vadd.f32 %v438_v37, %v1018_v20  ;;  %v469_v61 = vrot.slane %v1206_v35, 7  ;;  %661 = vtanh.f32 %v518_v49  ;;  %v1214_v37 = vld [vmem:[#allocation15_spill] sm:$0xff] }
  0xde   :  { %v488_v28 = vmul.f32 %v1044_v8, %v468_v21  ;;  %v503_v10 = vadd.f32 %v487_v43, %v451_v30  ;;  %v521_v29 = vadd.f32 %v1064_v1, %v501_v7  ;;  %663 = vtanh.f32 %v519_v4  ;;  %v1217_v7 = vld [vmem:[#allocation18_spill] sm:$0xff] }
  0xdf   :  { %v654_v57 = vpop.eup %653  ;;  %v455_v45 = vadd.f32 %v439_v19, %v1020_v2  ;;  %v456_v58 = vadd.f32 %v440_v52, %v1022_v38  ;;  %v470_v0 = vrot.slane %v1207_v14, 7  ;;  %v489_v27 = vmul.f32 %v1044_v8, %v469_v61  ;;  %v1212_v2 = vld [vmem:[#allocation13_spill] sm:$0xff] }
  0xe0   :  { %v656_v40 = vpop.eup %655  ;;  %v504_v20 = vadd.f32 %v488_v28, %v452_v44  ;;  %v522_v35 = vadd.f32 %v1064_v1, %v502_v22  ;;  %665 = vtanh.f32 %v520_v55  ;;  %v546_v6 = vsub.f32 %v1211_v46, %v654_v57  ;;  %v1218_v55 = vld [vmem:[#allocation19_spill] sm:$0xff] }
  0xe1   :  { %v658_v47 = vpop.eup %657  ;;  %v471_v31 = vrot.slane %v1208_v63, 7  ;;  %v490_v32 = vmul.f32 %v1044_v8, %v470_v0  ;;  %v505_v60 = vadd.f32 %v489_v27, %v453_v13  ;;  %v547_v48 = vsub.f32 %v1212_v2, %v656_v40  ;;  %v1220_v27 = vld [vmem:[#allocation21_spill] sm:$0xff]  ;;  %v1222_v2 = vld [vmem:[#allocation23_spill] sm:$0xff] }
  0xe2   :  { %v660_v38 = vpop.eup %659  ;;  %v523_v14 = vadd.f32 %v1064_v1, %v503_v10  ;;  %667 = vtanh.f32 %v521_v29  ;;  %v548_v39 = vsub.f32 %v1213_v33, %v658_v47  ;;  %v562_v41 = vand.u32 2147483647, %v546_v6  ;;  %v1219_v10 = vld [vmem:[#allocation20_spill] sm:$0xff]  ;;  %v1221_v6 = vld [vmem:[#allocation22_spill] sm:$0xff] }
  0xe3   :  { %v662_v50 = vpop.eup %661  ;;  %v457_v11 = vadd.f32 %v441_v54, %v1027_v3  ;;  %v472_v15 = vrot.slane %v1209_v62, 7  ;;  %v549_v51 = vsub.f32 %v1214_v37, %v660_v38  ;;  %v563_v63 = vand.u32 2147483647, %v547_v48 }
  0xe4   :  { %v664_v16 = vpop.eup %663  ;;  %v491_v17 = vmul.f32 %v1044_v8, %v471_v31  ;;  %v506_v34 = vadd.f32 %v490_v32, %v454_v59  ;;  %v524_v36 = vadd.f32 %v1064_v1, %v504_v20  ;;  %669 = vtanh.f32 %v522_v35 }
  0xe5   :  { %v473_v18 = vrot.slane %v1210_v9, 7  ;;  %v550_v19 = vsub.f32 %v1215_v23, %v662_v50  ;;  %v564_v52 = vand.u32 2147483647, %v548_v39  ;;  %v578_v24 = vadd.f32 %v563_v63, %v562_v41  ;;  %v1223_v39 = vld [vmem:[#allocation24_spill] sm:$0xff]  ;;  %v1226_v23 = vld [vmem:[#allocation27_spill] sm:$0xff] }
  0xe6   :  { %v666_v12 = vpop.eup %665  ;;  %v492_v3 = vmul.f32 %v1044_v8, %v472_v15  ;;  %v507_v62 = vadd.f32 %v491_v17, %v455_v45  ;;  %v525_v5 = vadd.f32 %v1064_v1, %v505_v60  ;;  %671 = vtanh.f32 %v523_v14  ;;  %v1224_v15 = vld [vmem:[#allocation25_spill] sm:$0xff]  ;;  %v1225_v17 = vld [vmem:[#allocation26_spill] sm:$0xff] }
  0xe7   :  { %v551_v26 = vsub.f32 %v1216_v25, %v664_v16  ;;  %v565_v53 = vand.u32 2147483647, %v549_v51  ;;  %v579_v30 = vadd.f32 %v578_v24, %v564_v52  ;;  %v493_v49 = vmul.f32 %v1044_v8, %v473_v18 }
  0xe8   :  { %v668_v42 = vpop.eup %667  ;;  %v508_v56 = vadd.f32 %v492_v3, %v456_v58  ;;  %v526_v9 = vadd.f32 %v1064_v1, %v506_v34  ;;  %673 = vtanh.f32 %v524_v36  ;;  %v552_v4 = vsub.f32 %v1217_v7, %v666_v12 }
  0xe9   :  { %v566_v54 = vand.u32 2147483647, %v550_v19  ;;  %v580_v44 = vadd.f32 %v579_v30, %v565_v53  ;;  %v509_v43 = vadd.f32 %v493_v49, %v457_v11  ;;  %v527_v22 = vadd.f32 %v1064_v1, %v507_v62 }
  0xea   :  { %v670_v21 = vpop.eup %669  ;;  %675 = vtanh.f32 %v525_v5  ;;  %v553_v13 = vsub.f32 %v1218_v55, %v668_v42  ;;  %v567_v59 = vand.u32 2147483647, %v551_v26  ;;  %v528_v8 = vadd.f32 %v1064_v1, %v508_v56 }
  0xeb   :  { %v581_v61 = vadd.f32 %v580_v44, %v566_v54  ;;  %677 = vtanh.f32 %v526_v9  ;;  %v554_v29 = vsub.f32 %v1219_v10, %v670_v21  ;;  %v568_v57 = vand.u32 2147483647, %v552_v4 }
  0xec   :  { %v672_v28 = vpop.eup %671  ;;  %v529_v0 = vadd.f32 %v1064_v1, %v509_v43  ;;  %679 = vtanh.f32 %v527_v22  ;;  %v569_v20 = vand.u32 2147483647, %v553_v13 }
  0xed   :  { %v582_v45 = vadd.f32 %v581_v61, %v567_v59  ;;  %v555_v40 = vsub.f32 %v1220_v27, %v672_v28  ;;  %681 = vtanh.f32 %v528_v8  ;;  %v570_v31 = vand.u32 2147483647, %v554_v29 }
  0xee   :  { %v674_v58 = vpop.eup %673  ;;  %683 = vtanh.f32 %v529_v0 }
  0xef   :  { %v583_v35 = vadd.f32 %v582_v45, %v568_v57  ;;  %v556_v47 = vsub.f32 %v1221_v6, %v674_v58  ;;  %v571_v38 = vand.u32 2147483647, %v555_v40 }
  0xf0   :  { %v676_v46 = vpop.eup %675 }
  0xf1   :  { %v584_v32 = vadd.f32 %v583_v35, %v569_v20  ;;  %v678_v60 = vpop.eup %677  ;;  %v557_v48 = vsub.f32 %v1222_v2, %v676_v46  ;;  %v572_v41 = vand.u32 2147483647, %v556_v47 }
  0xf2   :  { %v680_v33 = vpop.eup %679  ;;  %v558_v1 = vsub.f32 %v1223_v39, %v678_v60 }
  0xf3   :  { %v585_v14 = vadd.f32 %v584_v32, %v570_v31  ;;  %v682_v11 = vpop.eup %681  ;;  %v559_v37 = vsub.f32 %v1224_v15, %v680_v33  ;;  %v573_v51 = vand.u32 2147483647, %v557_v48 }
  0xf4   :  { %v684_v16 = vpop.eup %683  ;;  %v560_v34 = vsub.f32 %v1225_v17, %v682_v11  ;;  %v574_v36 = vand.u32 2147483647, %v558_v1 }
  0xf5   :  { %v586_v50 = vadd.f32 %v585_v14, %v571_v38  ;;  %v561_v19 = vsub.f32 %v1226_v23, %v684_v16  ;;  %v575_v52 = vand.u32 2147483647, %v559_v37 }
  0xf6   :  { %v576_v12 = vand.u32 2147483647, %v560_v34 }
  0xf7   :  { %v587_v63 = vadd.f32 %v586_v50, %v572_v41  ;;  %v577_v62 = vand.u32 2147483647, %v561_v19 }
  0xf9   :  { %v588_v18 = vadd.f32 %v587_v63, %v573_v51 }
  0xfb   :  { %v589_v24 = vadd.f32 %v588_v18, %v574_v36 }
  0xfd   :  { %v590_v3 = vadd.f32 %v589_v24, %v575_v52 }
  0xff   :  { %v591_v5 = vadd.f32 %v590_v3, %v576_v12 }
 0x101   :  { %v592_v25 = vadd.f32 %v591_v5, %v577_v62 }
 0x103   :  { %593 = vst [vmem:[#allocation8] sm:$0xff] %v592_v25 }
 0x104   :  { %604 = dma.vmem_to_hbm [thread:$0]  %s600_s2, 128, %s602_s28, [#allocation4]  }
 0x105   :  { %785 = dma.done.wait [#allocation4], 128  }
 0x106   :  { %786 = vsyncadd [#allocation4], 4294967168 }
 0x107   :  { %609 = vsyncpa [#allocation3], 1 }
 0x108   :  { %610 = vsyncpa [#allocation6], 1 }
 0x109   :  { %611 = vsyncpa [#allocation4], 1 }

</bundles_post_ra>
